<compile_context>
chip_gen: v7x
topology: tpu7x:2x2x1
jax: 0.10.0
libtpu: 0.0.40
codegen_flags: <defaults>
</compile_context>

<pallas_src>
import numpy as np
import jax
import jax.numpy as jnp
from jax.experimental import pallas as pl
from jax.experimental.pallas import tpu as pltpu


def _cdiv(a, b):
    return -(-a // b)


def _round_up(a, m):
    return _cdiv(a, m) * m


def _vmem_params():
    """(double-buffered working-set budget, scoped vmem_limit_bytes)."""
    try:
        cap = int(pltpu.get_tpu_info().vmem_capacity_bytes)
    except Exception:  # query unavailable -> conservative, safe everywhere
        cap = 0
    if cap and cap <= 64 * 1024 * 1024:          # v7x-class: 64 MiB physical VMEM
        return 20 * 1024 * 1024, 40 * 1024 * 1024
    if cap >= 96 * 1024 * 1024:                  # v5e / v6e: 128 MiB physical VMEM
        return 32 * 1024 * 1024, 64 * 1024 * 1024
    return 24 * 1024 * 1024, 48 * 1024 * 1024


_VMEM_BUDGET, _VMEM_LIMIT = _vmem_params()


def _pick_rows(total_rows, row_bytes, extra_bytes=0, max_rows=1024):
    """Row tile that is a multiple of 8 (or the full extent), fits the
    double-buffered VMEM budget, prefers >= 2 grid steps, and never falls back
    to a huge full-extent tile (the caller pads rows to a multiple of it)."""
    budget = max(_VMEM_BUDGET - extra_bytes, 2 * 1024 * 1024)
    fit = budget // max(1, 2 * row_bytes)
    limit = max(8, (min(max_rows, fit) // 8) * 8)
    if total_rows <= limit:
        if total_rows >= 16 and total_rows % 16 == 0:
            return total_rows // 2               # >=2 steps: pipelining / megacore
        return total_rows                        # full extent (always legal)
    t = limit
    while t >= max(8, limit // 2):               # exact divisor near limit: no pad
        if total_rows % t == 0:
            return t
        t -= 8
    steps = _cdiv(total_rows, limit)             # fixed tile + small padded tail
    return min(limit, _round_up(_cdiv(total_rows, steps), 8))


def _pick_group(h, w, target=128, max_gw=512):
    """Group G output rows per kernel row.  Prefer G*W a multiple of 128
    (unmasked lane-dense stores) under a size cap, else the smallest G with
    G*W >= 128, else the whole height."""
    for g in range(1, h + 1):
        if h % g == 0 and target <= g * w <= max_gw and (g * w) % target == 0:
            return g
    for g in range(1, h + 1):
        if h % g == 0 and g * w >= target:
            return g
    return h


def _pool_matrix(g, w):
    """(4*g*w, g*w) constant implementing a 2x2/stride-2 average pool on rows
    that hold 2g consecutive spatial rows of width 2w (row-major)."""
    p = np.zeros((4 * g * w, g * w), np.float32)
    for pr in range(g):
        for j in range(w):
            v = pr * w + j
            for di in range(2):
                for dj in range(2):
                    u = (2 * pr + di) * 2 * w + 2 * j + dj
                    p[u, v] = 0.25
    return p


# ---------------------------------------------------------------------------
# Kernel 1: stream y once -> pooled y (small MXU matmul) + per-row sums of
# x and y (XLU lane reductions) for the global average pools.
# ---------------------------------------------------------------------------
def _pool_gap_kernel(x_ref, y_ref, p_ref, ypool_ref, sums_ref):
    y = y_ref[...]
    ypool_ref[...] = jnp.dot(y, p_ref[...], preferred_element_type=jnp.float32)
    sums_ref[...] = jnp.concatenate(
        [jnp.sum(x_ref[...], axis=-1, keepdims=True),
         jnp.sum(y, axis=-1, keepdims=True)], axis=1)


# ---------------------------------------------------------------------------
# Kernel 2: per-channel gating + add (pure VPU, fully memory bound).
# ---------------------------------------------------------------------------
def _gate_add_kernel(x_ref, yp_ref, g_ref, o_ref):
    g = g_ref[...]
    o_ref[...] = (x_ref[...] * g[:, 0:1] + g[:, 1:2] * yp_ref[...]).astype(o_ref.dtype)


@jax.jit
def pmsf_forward(x, y, w_fc, w_fc1, w_fc2):
    """x: (B, C, H, W), y: (B, C, 2H, 2W), f32.
    w_fc: (2C, hidden), w_fc1/w_fc2: (hidden, C) (transposed torch Linear).
    Returns (B, C, H, W) f32."""
    B, C, H, W = x.shape
    assert y.shape == (B, C, 2 * H, 2 * W), "y must be 2x the spatial size of x"

    G = _pick_group(H, W)
    reps = H // G
    R = B * C * reps
    GW = G * W

    # Contiguous reshapes only (free): each row = G output rows / 2G input rows.
    xg = x.reshape(R, GW).astype(jnp.float32)
    yg = y.reshape(R, 4 * GW).astype(jnp.float32)
    pmat = jnp.asarray(_pool_matrix(G, W))               # (4GW, GW), tiny constant
    pool_bytes = 2 * pmat.size * 4                       # double-buffered constant

    tr = _pick_rows(R, (GW + 4 * GW + GW + 2) * 4, extra_bytes=pool_bytes)
    Rp = _round_up(R, tr)
    if Rp != R:                                          # pad tail rows (zeros)
        xg = jnp.pad(xg, ((0, Rp - R), (0, 0)))
        yg = jnp.pad(yg, ((0, Rp - R), (0, 0)))

    # ---- stage 1: pool + row-sums, y streamed from HBM exactly once ----
    y_pool, sums = pl.pallas_call(
        _pool_gap_kernel,
        grid=(Rp // tr,),
        in_specs=[pl.BlockSpec((tr, GW), lambda i: (i, 0)),
                  pl.BlockSpec((tr, 4 * GW), lambda i: (i, 0)),
                  # grid-invariant block: fetched once, reused every step
                  pl.BlockSpec((4 * GW, GW), lambda i: (0, 0))],
        out_specs=(pl.BlockSpec((tr, GW), lambda i: (i, 0)),
                   pl.BlockSpec((tr, 2), lambda i: (i, 0))),
        out_shape=(jax.ShapeDtypeStruct((Rp, GW), jnp.float32),
                   jax.ShapeDtypeStruct((Rp, 2), jnp.float32)),
        compiler_params=pltpu.CompilerParams(
            dimension_semantics=("parallel",),
            vmem_limit_bytes=_VMEM_LIMIT),
    )(xg, yg, pmat)

    # ---- GAPs from the per-row sums (tiny) + FC / sigmoid gates in jnp ----
    row_sums = sums[:R].reshape(B * C, reps, 2)
    x_gap = (row_sums[:, :, 0].sum(axis=1) / (H * W)).reshape(B, C)
    y_gap = (row_sums[:, :, 1].sum(axis=1) / (4 * H * W)).reshape(B, C)
    feat = jnp.concatenate([x_gap, y_gap], axis=1)
    common = jax.nn.relu(feat @ w_fc.astype(jnp.float32))
    xw = jax.nn.sigmoid(common @ w_fc1.astype(jnp.float32))   # (B, C)
    yw = jax.nn.sigmoid(common @ w_fc2.astype(jnp.float32))   # (B, C)

    gates = jnp.stack([xw.reshape(B * C), yw.reshape(B * C)], axis=1)  # (B*C, 2)
    gates = jnp.broadcast_to(gates[:, None, :], (B * C, reps, 2)).reshape(R, 2)
    if Rp != R:
        gates = jnp.pad(gates, ((0, Rp - R), (0, 0)))

    # ---- stage 2: gate + add, reads only x and the pooled y ----
    out = pl.pallas_call(
        _gate_add_kernel,
        grid=(Rp // tr,),
        in_specs=[pl.BlockSpec((tr, GW), lambda i: (i, 0)),
                  pl.BlockSpec((tr, GW), lambda i: (i, 0)),
                  pl.BlockSpec((tr, 2), lambda i: (i, 0))],
        out_specs=pl.BlockSpec((tr, GW), lambda i: (i, 0)),
        out_shape=jax.ShapeDtypeStruct((Rp, GW), jnp.float32),
        compiler_params=pltpu.CompilerParams(
            dimension_semantics=("parallel",),
            vmem_limit_bytes=_VMEM_LIMIT),
    )(xg, y_pool, gates)

    return out[:R].reshape(B, C, H, W)


# ---------------------------------------------------------------------------
# Pure-JAX reference (mirrors the PyTorch forward exactly).
# ---------------------------------------------------------------------------
def pmsf_reference(x, y, w_fc, w_fc1, w_fc2):
    B, C, H, W = x.shape
    x_gap = x.mean(axis=(2, 3))
    y_gap = y.mean(axis=(2, 3))
    feat = jnp.concatenate([x_gap, y_gap], axis=1)
    common = jax.nn.relu(feat @ w_fc)
    xw = jax.nn.sigmoid(common @ w_fc1)[:, :, None, None]
    yw = jax.nn.sigmoid(common @ w_fc2)[:, :, None, None]
    y_pool = y.reshape(B, C, H, 2, W, 2).mean(axis=(3, 5))
    return x * xw + yw * y_pool


if __name__ == "__main__":
    # x has C channels; module `channel` = 2*C (it consumes cat of the two GAPs).
    B, C, H, W = 2, 4, 16, 16
    channel = 2 * C
    reduction = 2                      # default 16 would give hidden=0 at this toy size
    hidden = channel // reduction      # = 4

    key = jax.random.PRNGKey(0)
    kx, ky, k0, k1, k2 = jax.random.split(key, 5)
    x = jax.random.normal(kx, (B, C, H, W), jnp.float32)
    y = jax.random.normal(ky, (B, C, 2 * H, 2 * W), jnp.float32)
    # torch nn.Linear weights are (out, in); we store them transposed (in, out).
    w_fc = jax.random.normal(k0, (channel, hidden), jnp.float32) * 0.3
    w_fc1 = jax.random.normal(k1, (hidden, channel // 2), jnp.float32) * 0.3
    w_fc2 = jax.random.normal(k2, (hidden, channel // 2), jnp.float32) * 0.3

    out = pmsf_forward(x, y, w_fc, w_fc1, w_fc2)
    out = jax.block_until_ready(out)

    ref = pmsf_reference(x, y, w_fc, w_fc1, w_fc2)
    np.testing.assert_allclose(np.asarray(out), np.asarray(ref), rtol=1e-2, atol=5e-3)
    print("KERNEL_OK")
</pallas_src>

<mosaic_0001>
module attributes {stable_mosaic.version = 11 : i64} {
  func.func @_pool_gap_kernel(%arg0: i32, %arg1: memref<8x128xf32, #tpu.memory_space<vmem>>, %arg2: memref<8x512xf32, #tpu.memory_space<vmem>>, %arg3: memref<512x128xf32, #tpu.memory_space<vmem>>, %arg4: memref<8x128xf32, #tpu.memory_space<vmem>>, %arg5: memref<8x2xf32, #tpu.memory_space<vmem>>) attributes {dimension_semantics = [#tpu.dimension_semantics<parallel>], iteration_bounds = array<i64: 2>, scalar_prefetch = 0 : i64, scratch_operands = 0 : i64, tpu.core_type = #tpu.core_type<tc>, window_params = [{transform_indices = @transform_0, window_bounds = array<i64: 8, 128>}, {transform_indices = @transform_1, window_bounds = array<i64: 8, 512>}, {pipeline_mode = #tpu.pipeline_mode<synchronous>, transform_indices = @transform_2, window_bounds = array<i64: 512, 128>}, {transform_indices = @transform_3, window_bounds = array<i64: 8, 128>}, {transform_indices = @transform_4, window_bounds = array<i64: 8, 2>}]} {
    %c0 = arith.constant 0 : index
    %c0_0 = arith.constant 0 : index
    %0 = vector.load %arg2[%c0, %c0_0] : memref<8x512xf32, #tpu.memory_space<vmem>>, vector<8x512xf32>
    %c0_1 = arith.constant 0 : index
    %c0_2 = arith.constant 0 : index
    %1 = vector.load %arg3[%c0_1, %c0_2] : memref<512x128xf32, #tpu.memory_space<vmem>>, vector<512x128xf32>
    %cst = arith.constant dense<0.000000e+00> : vector<8x128xf32>
    %2 = tpu.matmul %0, %1, %cst {dimension_numbers = #tpu.dot_dimension_numbers<[1], [0], [0], [1], [0, 0, 1, 1], [], []>} : vector<8x512xf32>, vector<512x128xf32>, vector<8x128xf32> -> vector<8x128xf32>
    %c0_3 = arith.constant 0 : index
    %c0_4 = arith.constant 0 : index
    %3 = vector.load %arg4[%c0_3, %c0_4] : memref<8x128xf32, #tpu.memory_space<vmem>>, vector<8x128xf32>
    tpu.vector_store %arg4[%c0_3, %c0_4], %2 {strides = array<i32>} : memref<8x128xf32, #tpu.memory_space<vmem>>, vector<8x128xf32>,
    %c0_5 = arith.constant 0 : index
    %c0_6 = arith.constant 0 : index
    %4 = vector.load %arg1[%c0_5, %c0_6] : memref<8x128xf32, #tpu.memory_space<vmem>>, vector<8x128xf32>
    %cst_7 = arith.constant dense<0.000000e+00> : vector<8xf32>
    %5 = vector.multi_reduction <add>, %4, %cst_7 [1] : vector<8x128xf32> to vector<8xf32>
    %6 = vector.shape_cast %5 : vector<8xf32> to vector<8x1xf32>
    %cst_8 = arith.constant dense<0.000000e+00> : vector<8xf32>
    %7 = vector.multi_reduction <add>, %0, %cst_8 [1] : vector<8x512xf32> to vector<8xf32>
    %8 = vector.shape_cast %7 : vector<8xf32> to vector<8x1xf32>
    %9 = tpu.concatenate %6, %8 in 1 : vector<8x1xf32>, vector<8x1xf32> -> vector<8x2xf32>
    %c0_9 = arith.constant 0 : index
    %c0_10 = arith.constant 0 : index
    %10 = vector.load %arg5[%c0_9, %c0_10] : memref<8x2xf32, #tpu.memory_space<vmem>>, vector<8x2xf32>
    tpu.vector_store %arg5[%c0_9, %c0_10], %9 {strides = array<i32>} : memref<8x2xf32, #tpu.memory_space<vmem>>, vector<8x2xf32>,
    return
  }
  func.func @transform_0(%arg0: i32) -> (i32, i32) {
    %c0_i32 = arith.constant 0 : i32
    %c0_i32_0 = arith.constant 0 : i32
    return %arg0, %c0_i32 : i32, i32
  }
  func.func @transform_1(%arg0: i32) -> (i32, i32) {
    %c0_i32 = arith.constant 0 : i32
    %c0_i32_0 = arith.constant 0 : i32
    return %arg0, %c0_i32 : i32, i32
  }
  func.func @transform_2(%arg0: i32) -> (i32, i32) {
    %c0_i32 = arith.constant 0 : i32
    %c0_i32_0 = arith.constant 0 : i32
    %c0_i32_1 = arith.constant 0 : i32
    return %c0_i32, %c0_i32_0 : i32, i32
  }
  func.func @transform_3(%arg0: i32) -> (i32, i32) {
    %c0_i32 = arith.constant 0 : i32
    %c0_i32_0 = arith.constant 0 : i32
    return %arg0, %c0_i32 : i32, i32
  }
  func.func @transform_4(%arg0: i32) -> (i32, i32) {
    %c0_i32 = arith.constant 0 : i32
    %c0_i32_0 = arith.constant 0 : i32
    return %arg0, %c0_i32 : i32, i32
  }
}

module attributes {stable_mosaic.version = 11 : i64} {
  func.func @_gate_add_kernel(%arg0: i32, %arg1: memref<8x128xf32, #tpu.memory_space<vmem>>, %arg2: memref<8x128xf32, #tpu.memory_space<vmem>>, %arg3: memref<8x2xf32, #tpu.memory_space<vmem>>, %arg4: memref<8x128xf32, #tpu.memory_space<vmem>>) attributes {dimension_semantics = [#tpu.dimension_semantics<parallel>], iteration_bounds = array<i64: 2>, scalar_prefetch = 0 : i64, scratch_operands = 0 : i64, tpu.core_type = #tpu.core_type<tc>, window_params = [{transform_indices = @transform_0, window_bounds = array<i64: 8, 128>}, {transform_indices = @transform_1, window_bounds = array<i64: 8, 128>}, {transform_indices = @transform_2, window_bounds = array<i64: 8, 2>}, {transform_indices = @transform_3, window_bounds = array<i64: 8, 128>}]} {
    %c0 = arith.constant 0 : index
    %c0_0 = arith.constant 0 : index
    %0 = vector.load %arg3[%c0, %c0_0] : memref<8x2xf32, #tpu.memory_space<vmem>>, vector<8x2xf32>
    %c0_1 = arith.constant 0 : index
    %c0_2 = arith.constant 0 : index
    %1 = vector.load %arg1[%c0_1, %c0_2] : memref<8x128xf32, #tpu.memory_space<vmem>>, vector<8x128xf32>
    %2 = vector.extract_strided_slice %0 {offsets = [0, 0], sizes = [8, 1], strides = [1, 1]} : vector<8x2xf32> to vector<8x1xf32>
    %3 = vector.broadcast %2 : vector<8x1xf32> to vector<8x128xf32>
    %4 = arith.mulf %1, %3 : vector<8x128xf32>
    %5 = vector.extract_strided_slice %0 {offsets = [0, 1], sizes = [8, 1], strides = [1, 1]} : vector<8x2xf32> to vector<8x1xf32>
    %c0_3 = arith.constant 0 : index
    %c0_4 = arith.constant 0 : index
    %6 = vector.load %arg2[%c0_3, %c0_4] : memref<8x128xf32, #tpu.memory_space<vmem>>, vector<8x128xf32>
    %7 = vector.broadcast %5 : vector<8x1xf32> to vector<8x128xf32>
    %8 = arith.mulf %7, %6 : vector<8x128xf32>
    %9 = arith.addf %4, %8 : vector<8x128xf32>
    %c0_5 = arith.constant 0 : index
    %c0_6 = arith.constant 0 : index
    %10 = vector.load %arg4[%c0_5, %c0_6] : memref<8x128xf32, #tpu.memory_space<vmem>>, vector<8x128xf32>
    tpu.vector_store %arg4[%c0_5, %c0_6], %9 {strides = array<i32>} : memref<8x128xf32, #tpu.memory_space<vmem>>, vector<8x128xf32>,
    return
  }
  func.func @transform_0(%arg0: i32) -> (i32, i32) {
    %c0_i32 = arith.constant 0 : i32
    %c0_i32_0 = arith.constant 0 : i32
    return %arg0, %c0_i32 : i32, i32
  }
  func.func @transform_1(%arg0: i32) -> (i32, i32) {
    %c0_i32 = arith.constant 0 : i32
    %c0_i32_0 = arith.constant 0 : i32
    return %arg0, %c0_i32 : i32, i32
  }
  func.func @transform_2(%arg0: i32) -> (i32, i32) {
    %c0_i32 = arith.constant 0 : i32
    %c0_i32_0 = arith.constant 0 : i32
    return %arg0, %c0_i32 : i32, i32
  }
  func.func @transform_3(%arg0: i32) -> (i32, i32) {
    %c0_i32 = arith.constant 0 : i32
    %c0_i32_0 = arith.constant 0 : i32
    return %arg0, %c0_i32 : i32, i32
  }
}

</mosaic_0001>

<bundles_post_ra>
// kernel: pmsf_forward.2
= control target key start
LH: loop header
LB: loop body
LE: loop exit
PB: predicated region body
PF: predicated region fallthrough
CT: control target
= control target key end

     0   :  { %10 = vsyncpa [#allocation3], 0  ;;  %s806_s15 = smov 0   ;;  %s879_s0 = inlined_call_operand.vmem [shape: f32[16,128], index: 0, kind: input, shape index: {}]   ;;  %s880_s1 = inlined_call_operand.vmem [shape: f32[16,512], index: 1, kind: input, shape index: {}]   ;;  %s881_s2 = inlined_call_operand.hbm [shape: f32[512,128], index: 2, kind: input, shape index: {}]   ;;  %s882_s3 = inlined_call_operand.vmem [shape: f32[16,128], index: 3, kind: output, shape index: {0}]   ;;  %s883_s4 = inlined_call_operand.vmem [shape: f32[16,2], index: 4, kind: output, shape index: {1}]  }
   0x1 LB: > { %s812_s16 = sadd.s32 4294967295, %s776_s15   ;;  %p570_p0 = scmp.ge.s32.totalorder %s776_s15, 1  ;;  %s776_s15 = sphi %s806_s15, %s16_s15  }
   0x2   : > { %p146_p1 = scmp.lt.s32.totalorder %s776_s15, 3  ;;  %s778_s17 = smov [#allocation2]  }
   0x3   : > { %s158_s18 = sshll.u32 %s778_s17, 4  ;;  %p884_p3 = scmp.eq.s32.totalorder %s812_s16, 0  ;;  %s159_s18 = int_to_ptr.vmem [resolvable:$true] %s158_s18 }
   0x4   : > { %p816_p2 = pnand %p570_p0, %p146_p1  ;;  %s738_s23 = scalar_lea.hbm %s881_s2, 8192 }
   0x5   : > { %p739_p6 = scmp.ne.s32.totalorder %s881_s2, %s738_s23  ;;  %p745_p10 = scmp.lt.u32.totalorder %s738_s23, %s881_s2 }
   0x6   : > { %s886_s19 = scalar_select %p816_p2, 1, 0 }
   0x7   : > { %p721_p4 = pneg %p816_p2 }
   0x9   : > { %p825_p5 = pnand %p884_p3, %p721_p4 }
   0xb   : > { %p740_p7 = pneg %p825_p5 }
   0xd   : > { %p741_p8 = pnand %p740_p7, %p739_p6 }
   0xf   : > { %p742_p9 = pneg %p741_p8 }
  0x11   : > { %p747_p11 = pnand %p745_p10, %p742_p9 }
  0x13   : > { %750 = shalt.err (!%p747_p11)
}
  0x14   : > { %s751_s28 = scalar_lea.vmem %s159_s18, 8192  ;;  %p759_p1 = scmp.lt.s32.totalorder %s159_s18, %s159_s18 }
  0x15   : > { %p752_p12 = scmp.ne.s32.totalorder %s159_s18, %s751_s28  ;;  %p760_p4 = scmp.lt.s32.totalorder %s751_s28, %s751_s28 }
  0x17   : > { %p754_p13 = pnand %p752_p12, %p740_p7  ;;  %p761_p3 = por %p760_p4, %p759_p1 }
  0x19   : > { %p755_p0 = pneg %p754_p13 }
  0x1b   : > { %p762_p2 = pnand %p761_p3, %p755_p0 }
  0x1d   : > { %765 = shalt.err (!%p762_p2)
}
  0x1e   : > { %s779_s29 = smov 128   ;;  %s780_s30 = smov 8  }
  0x1f   : > { %724 = dma.hbm_to_vmem [thread:$0]  (!%p825_p5), %s881_s2, 8192, %s159_s18, [#allocation3], %s779_s29, %s779_s29, %s780_s30  }
  0x20   : > { %p888_p6 = scmp.ne.s32.totalorder %s886_s19, 0 }
  0x21   : > { %p889_p8 = scmp.eq.s32.totalorder (!%p888_p6), %s812_s16, 0 }
  0x22   : > { %189 = sbr.rel (%p888_p6) target bundleno = 297 (0x129), region = 32 }
  0x29   : > { %771 = dma.done.wait (%p889_p8), [#allocation3], 8192   ;;  %p890_p7 = pmov %p889_p8 }
  0x2a   : > { %v259_v0 = vld [vmem:[#allocation2 + $0x80] sm:$0xff]  ;;  %v260_v1 = vld [vmem:[#allocation2 + $0x88] sm:$0xff]  ;;  %v261_v11 = vld [vmem:[#allocation2 + $0x90] sm:$0xff]  ;;  %p222_p2 = scmp.lt.s32.totalorder %s812_s16, 1  ;;  %vm456_vm0 = vcmask 7168   ;;  %vm458_vm1 = vcmask 15360  }
  0x2b   : > { %773 = vsyncadd (%p890_p7), [#allocation3], 4294959104  ;;  %v291_v2 = vld [vmem:[#allocation2 + $0x180] sm:$0xff]  ;;  %v653_v3 = vpack.c.bf16 %v260_v1, %v259_v0  ;;  %v292_v4 = vld [vmem:[#allocation2 + $0x188] sm:$0xff] }
  0x2c   : > { %v243_v5 = vld [vmem:[#allocation2] sm:$0xff]  ;;  %v244_v6 = vld [vmem:[#allocation2 + $0x8] sm:$0xff]  ;;  %v685_v7 = vpack.c.bf16 %v292_v4, %v291_v2  ;;  %v262_v13 = vld [vmem:[#allocation2 + $0x98] sm:$0xff]  ;;  %s892_s16 = smov (!%p222_p2, %s812_s16), 1 }
  0x2d   : > { %v655_v8 = vpack.c.bf16 %v244_v6, %v243_v5  ;;  %v275_v9 = vld [vmem:[#allocation2 + $0x100] sm:$0xff]  ;;  %v276_v10 = vld [vmem:[#allocation2 + $0x108] sm:$0xff]  ;;  %654 = vmatprep.subr.bf16.mxu0 %v653_v3  ;;  %v293_v14 = vld [vmem:[#allocation2 + $0x190] sm:$0xff]  ;;  %v657_v16 = vpack.c.bf16 %v262_v13, %v261_v11  ;;  %s582_s7 = sshll.u32 %s892_s16, 5  ;;  %s859_s8 = sshll.u32 %s892_s16, 3 }
  0x2e   : > { %v687_v12 = vpack.c.bf16 %v276_v10, %v275_v9  ;;  %v294_v15 = vld [vmem:[#allocation2 + $0x198] sm:$0xff]  ;;  %686 = vmatprep.subr.bf16.mxu1 %v685_v7  ;;  %v245_v18 = vld [vmem:[#allocation2 + $0x10] sm:$0xff]  ;;  %v263_v23 = vld [vmem:[#allocation2 + $0xa0] sm:$0xff]  ;;  %s230_s11 = scalar_lea.vmem %s880_s1, %s582_s7  ;;  %s225_s14 = scalar_lea.vmem %s879_s0, %s859_s8 }
  0x2f   : > { %656 = vmatpush3.bf16.msra.mxu0 %v655_v8  ;;  %v689_v17 = vpack.c.bf16 %v294_v15, %v293_v14  ;;  %v246_v19 = vld [vmem:[#allocation2 + $0x18] sm:$0xff]  ;;  %v277_v20 = vld [vmem:[#allocation2 + $0x110] sm:$0xff]  ;;  %v264_v24 = vld [vmem:[#allocation2 + $0xa8] sm:$0xff]  ;;  %s238_s18 = scalar_lea.vmem %s883_s4, %s859_s8  ;;  %s234_s21 = scalar_lea.vmem %s882_s3, %s859_s8 }
  0x30   : > { %688 = vmatpush3.bf16.msra.mxu1 %v687_v12  ;;  %v659_v21 = vpack.c.bf16 %v246_v19, %v245_v18  ;;  %v278_v22 = vld [vmem:[#allocation2 + $0x118] sm:$0xff]  ;;  %658 = vmatprep.subr.bf16.mxu0 %v657_v16  ;;  %v661_v26 = vpack.c.bf16 %v264_v24, %v263_v23  ;;  %v295_v27 = vld [vmem:[#allocation2 + $0x1a0] sm:$0xff]  ;;  %v296_v28 = vld [vmem:[#allocation2 + $0x1a8] sm:$0xff] }
  0x31   : > { %690 = vmatprep.subr.bf16.mxu1 %v689_v17  ;;  %v691_v25 = vpack.c.bf16 %v278_v22, %v277_v20  ;;  %v247_v29 = vld [vmem:[#allocation2 + $0x20] sm:$0xff]  ;;  %v693_v30 = vpack.c.bf16 %v296_v28, %v295_v27  ;;  %v248_v31 = vld [vmem:[#allocation2 + $0x28] sm:$0xff]  ;;  %v265_v35 = vld [vmem:[#allocation2 + $0xb0] sm:$0xff] }
  0x32   : > { %v279_v32 = vld [vmem:[#allocation2 + $0x120] sm:$0xff]  ;;  %v280_v33 = vld [vmem:[#allocation2 + $0x128] sm:$0xff]  ;;  %v663_v34 = vpack.c.bf16 %v248_v31, %v247_v29  ;;  %v266_v36 = vld [vmem:[#allocation2 + $0xb8] sm:$0xff] }
  0x33   : > { %660 = vmatpush3.bf16.msra.mxu0 %v659_v21  ;;  %v297_v37 = vld [vmem:[#allocation2 + $0x1b0] sm:$0xff]  ;;  %v695_v38 = vpack.c.bf16 %v280_v33, %v279_v32  ;;  %v665_v39 = vpack.c.bf16 %v266_v36, %v265_v35  ;;  %v298_v40 = vld [vmem:[#allocation2 + $0x1b8] sm:$0xff]  ;;  %v267_v46 = vld [vmem:[#allocation2 + $0xc0] sm:$0xff] }
  0x34   : > { %692 = vmatpush3.bf16.msra.mxu1 %v691_v25  ;;  %662 = vmatprep.subr.bf16.mxu0 %v661_v26  ;;  %v249_v41 = vld [vmem:[#allocation2 + $0x30] sm:$0xff]  ;;  %v250_v42 = vld [vmem:[#allocation2 + $0x38] sm:$0xff]  ;;  %v697_v43 = vpack.c.bf16 %v298_v40, %v297_v37  ;;  %v268_v47 = vld [vmem:[#allocation2 + $0xc8] sm:$0xff] }
  0x35   : > { %694 = vmatprep.subr.bf16.mxu1 %v693_v30  ;;  %v281_v44 = vld [vmem:[#allocation2 + $0x130] sm:$0xff]  ;;  %v282_v45 = vld [vmem:[#allocation2 + $0x138] sm:$0xff]  ;;  %v299_v48 = vld [vmem:[#allocation2 + $0x1c0] sm:$0xff]  ;;  %v667_v50 = vpack.c.bf16 %v250_v42, %v249_v41  ;;  %v669_v52 = vpack.c.bf16 %v268_v47, %v267_v46 }
  0x36   : > { %v300_v49 = vld [vmem:[#allocation2 + $0x1c8] sm:$0xff]  ;;  %v699_v51 = vpack.c.bf16 %v282_v45, %v281_v44  ;;  %v251_v53 = vld [vmem:[#allocation2 + $0x40] sm:$0xff]  ;;  %v269_v58 = vld [vmem:[#allocation2 + $0xd0] sm:$0xff] }
  0x37   : > { %664 = vmatpush3.bf16.msra.mxu0 %v663_v34  ;;  %v252_v54 = vld [vmem:[#allocation2 + $0x48] sm:$0xff]  ;;  %v283_v55 = vld [vmem:[#allocation2 + $0x140] sm:$0xff]  ;;  %v701_v56 = vpack.c.bf16 %v300_v49, %v299_v48  ;;  %v270_v59 = vld [vmem:[#allocation2 + $0xd8] sm:$0xff] }
  0x38   : > { %696 = vmatpush3.bf16.msra.mxu1 %v695_v38  ;;  %666 = vmatprep.subr.bf16.mxu0 %v665_v39  ;;  %v284_v57 = vld [vmem:[#allocation2 + $0x148] sm:$0xff]  ;;  %v301_v60 = vld [vmem:[#allocation2 + $0x1d0] sm:$0xff]  ;;  %v302_v61 = vld [vmem:[#allocation2 + $0x1d8] sm:$0xff]  ;;  %v671_v62 = vpack.c.bf16 %v252_v54, %v251_v53  ;;  %v673_v0 = vpack.c.bf16 %v270_v59, %v269_v58 }
  0x39   : > { %698 = vmatprep.subr.bf16.mxu1 %v697_v43  ;;  %v703_v63 = vpack.c.bf16 %v284_v57, %v283_v55  ;;  %v253_v1 = vld [vmem:[#allocation2 + $0x50] sm:$0xff]  ;;  %v254_v2 = vld [vmem:[#allocation2 + $0x58] sm:$0xff]  ;;  %v705_v4 = vpack.c.bf16 %v302_v61, %v301_v60  ;;  %v271_v6 = vld [vmem:[#allocation2 + $0xe0] sm:$0xff] }
  0x3a   : > { %v285_v3 = vld [vmem:[#allocation2 + $0x150] sm:$0xff]  ;;  %v286_v5 = vld [vmem:[#allocation2 + $0x158] sm:$0xff]  ;;  %v272_v7 = vld [vmem:[#allocation2 + $0xe8] sm:$0xff]  ;;  %v675_v11 = vpack.c.bf16 %v254_v2, %v253_v1 }
  0x3b   : > { %668 = vmatpush3.bf16.msra.mxu0 %v667_v50  ;;  %v303_v8 = vld [vmem:[#allocation2 + $0x1e0] sm:$0xff]  ;;  %v304_v9 = vld [vmem:[#allocation2 + $0x1e8] sm:$0xff]  ;;  %v707_v15 = vpack.c.bf16 %v286_v5, %v285_v3  ;;  %v677_v16 = vpack.c.bf16 %v272_v7, %v271_v6  ;;  %v273_v17 = vld [vmem:[#allocation2 + $0xf0] sm:$0xff] }
  0x3c   : > { %700 = vmatpush3.bf16.msra.mxu1 %v699_v51  ;;  %670 = vmatprep.subr.bf16.mxu0 %v669_v52  ;;  %v255_v10 = vld [vmem:[#allocation2 + $0x60] sm:$0xff]  ;;  %v256_v12 = vld [vmem:[#allocation2 + $0x68] sm:$0xff]  ;;  %v240_v19 = vld [vmem:[%s230_s11 + $0x8] sm:$0xff]  ;;  %v709_v20 = vpack.c.bf16 %v304_v9, %v303_v8 }
  0x3d   : > { %702 = vmatprep.subr.bf16.mxu1 %v701_v56  ;;  %v287_v13 = vld [vmem:[#allocation2 + $0x160] sm:$0xff]  ;;  %v288_v14 = vld [vmem:[#allocation2 + $0x168] sm:$0xff]  ;;  %v274_v21 = vld [vmem:[#allocation2 + $0xf8] sm:$0xff]  ;;  %371 = vmatprep.mubr.f32.mxu0 %v240_v19  ;;  %v679_v28 = vpack.c.bf16 %v256_v12, %v255_v10 }
  0x3e   : > { %v239_v18 = vld [vmem:[%s230_s11] sm:$0xff]  ;;  %v242_v23 = vld [vmem:[%s230_s11 + $0x18] sm:$0xff]  ;;  %v305_v25 = vld [vmem:[#allocation2 + $0x1f0] sm:$0xff]  ;;  %v711_v30 = vpack.c.bf16 %v288_v14, %v287_v13  ;;  %v681_v31 = vpack.c.bf16 %v274_v21, %v273_v17 }
  0x3f   : > { %672 = vmatpush3.bf16.msra.mxu0 %v671_v62  ;;  %v451_v22 = vadd.f32 %v240_v19, %v239_v18  ;;  %v448_v24 = vld [vmem:[%s225_s14] sm:$0xff]  ;;  %v306_v26 = vld [vmem:[#allocation2 + $0x1f8] sm:$0xff]  ;;  %441 = vmatprep.mubr.f32.mxu1 %v242_v23  ;;  %v257_v32 = vld [vmem:[#allocation2 + $0x70] sm:$0xff] }
  0x40   : > { %704 = vmatpush3.bf16.msra.mxu1 %v703_v63  ;;  %674 = vmatprep.subr.bf16.mxu0 %v673_v0  ;;  %v241_v27 = vld [vmem:[%s230_s11 + $0x10] sm:$0xff]  ;;  %v713_v34 = vpack.c.bf16 %v306_v26, %v305_v25  ;;  %v289_v35 = vld [vmem:[#allocation2 + $0x170] sm:$0xff] }
  0x41   : > { %706 = vmatprep.subr.bf16.mxu1 %v705_v4  ;;  %449 = vadd.xlane.f32.xlu0 %v448_v24  ;;  %v452_v29 = vadd.f32 %v451_v22, %v241_v27  ;;  %v258_v33 = vld [vmem:[#allocation2 + $0x78] sm:$0xff] }
  0x42   : > { %v290_v36 = vld [vmem:[#allocation2 + $0x178] sm:$0xff]  ;;  %v683_v38 = vpack.c.bf16 %v258_v33, %v257_v32 }
  0x43   : > { %676 = vmatpush3.bf16.msra.mxu0 %v675_v11  ;;  %v453_v37 = vadd.f32 %v452_v29, %v242_v23  ;;  %v715_v39 = vpack.c.bf16 %v290_v36, %v289_v35 }
  0x44   : > { %708 = vmatpush3.bf16.msra.mxu1 %v707_v15  ;;  %678 = vmatprep.subr.bf16.mxu0 %v677_v16 }
  0x45   : > { %710 = vmatprep.subr.bf16.mxu1 %v709_v20  ;;  %454 = vadd.xlane.f32.xlu0 %v453_v37 }
  0x47   : > { %680 = vmatpush3.bf16.msra.mxu0 %v679_v28 }
  0x48   : > { %712 = vmatpush3.bf16.msra.mxu1 %v711_v30  ;;  %682 = vmatprep.subr.bf16.mxu0 %v681_v31 }
  0x49   : > { %714 = vmatprep.subr.bf16.mxu1 %v713_v34 }
  0x4b   : > { %684 = vmatpush3.bf16.msra.mxu0 %v683_v38 }
  0x4c   : > { %716 = vmatpush3.bf16.msra.mxu1 %v715_v39 }
  0x4e   : > { %372 = vmatmul.mubr.f32.vlgmr.msra.gmra.mrb[0].mxu0 %v239_v18 }
  0x4f   : > { %442 = vmatmul.mubr.f32.vlgmr.msra.gmra.mrb[0].mxu1 %v241_v27 }
  0xce   : > { %v450_v40 = vpop.xlane.xlu0 %449 }
  0xd2   : > { %v455_v41 = vpop.xlane.xlu0 %454 }
  0xd3   : > { %v457_v42 = vsel %vm456_vm0, %v450_v40, %v455_v41 }
  0xd4   : > { %459 = vst.msk [vmem:[%s238_s18] sm:$0xff] %vm458_vm1, %v457_v42 }
 0x121   : > { %v615_v43 = vpop.f32.mrb[0].mxu0 }
 0x122   : > { %v650_v44 = vpop.f32.mrb[0].mxu1  ;;  %v616_v45 = vpop.f32.mrb[1].mxu0 }
 0x123   : > { %v617_v46 = vadd.f32 %v616_v45, %v615_v43  ;;  %v651_v47 = vpop.f32.mrb[1].mxu1 }
 0x124   : > { %v652_v48 = vadd.f32 %v651_v47, %v650_v44 }
 0x126   : > { %v444_v49 = vadd.f32 %v652_v48, %v617_v46 }
 0x128   : > { %447 = vst [vmem:[%s234_s21] sm:$0xff] %v444_v49 }
 0x129 PF: > { %s16_s15 = sadd.s32 1, %s776_s15  }
 0x12a   : > { %p13_p3 = scmp.ge.s32.totalorder %s16_s15, 4  }
 0x12c   :  { %15 = sbr.rel (!%p13_p3) target bundleno = 1 (0x1), region = 82 }
 0x133   :  { %493 = vsyncpa [#allocation3], 1 }
 0x134   :  { %495 = vsyncpa [#allocation3 + $0x1], 1 }

// kernel: pmsf_forward.3
= control target key start
LH: loop header
LB: loop body
LE: loop exit
PB: predicated region body
PF: predicated region fallthrough
CT: control target
= control target key end

     0   :  { %s346_s12 = smov 0   ;;  %s369_s0 = inlined_call_operand.vmem [shape: f32[16,128], index: 0, kind: input, shape index: {}]   ;;  %s370_s1 = inlined_call_operand.vmem [shape: f32[16,128], index: 1, kind: input, shape index: {}]   ;;  %s371_s2 = inlined_call_operand.vmem [shape: f32[16,2], index: 2, kind: input, shape index: {}]   ;;  %s372_s3 = inlined_call_operand.vmem [shape: f32[16,128], index: 3, kind: output, shape index: {}]  }
   0x1 LB: > { %s293_s13 = sadd.s32 4294967295, %s322_s12   ;;  %p297_p0 = scmp.ge.s32.totalorder %s322_s12, 1  ;;  %s322_s12 = sphi %s346_s12, %s13_s12  }
   0x2   : > { %p154_p1 = scmp.lt.s32.totalorder %s322_s12, 3 }
   0x4   : > { %p155_p2 = pnand %p297_p0, %p154_p1 }
   0x5   : > { %p184_p3 = scmp.lt.s32.totalorder (!%p155_p2), %s293_s13, 1  ;;  %v324_v0 = vmov (!%p155_p2), 0   ;;  %v325_v2 = vmov (!%p155_p2), 1  }
   0x6   : > { %158 = sbr.rel (%p155_p2) target bundleno = 155 (0x9b), region = 32  ;;  %314 = vset.pattern.permute.xlu0 (!%p155_p2), %v324_v0 }
   0xd   : > { %s374_s13 = smov (!%p184_p3, %s293_s13), 1 }
   0xe   : > { %s298_s14 = sshll.u32 %s374_s13, 3 }
   0xf   : > { %s195_s17 = scalar_lea.vmem %s371_s2, %s298_s14  ;;  %s187_s20 = scalar_lea.vmem %s369_s0, %s298_s14 }
  0x10   : > { %v200_v1 = vld [vmem:[%s195_s17] sm:$0xff]  ;;  %s191_s23 = scalar_lea.vmem %s370_s1, %s298_s14  ;;  %s199_s26 = scalar_lea.vmem %s372_s3, %s298_s14 }
  0x11   : > { %204 = vperm.xlu0 %314, %v200_v1   ;;  %v201_v4 = vld [vmem:[%s187_s20] sm:$0xff] }
  0x12   : > { %v208_v5 = vld [vmem:[%s191_s23] sm:$0xff] }
  0x15   : > { %315 = vset.pattern.permute.xlu0 %v325_v2 }
  0x16   : > { %210 = vperm.xlu0 %315, %v200_v1  }
  0x90   : > { %v205_v3 = vpop.permute.xlu0 %204 }
  0x91   : > { %v207_v7 = vmul.f32 %v205_v3, %v201_v4 }
  0x95   : > { %v211_v6 = vpop.permute.xlu0 %210 }
  0x96   : > { %v213_v8 = vmul.f32 %v211_v6, %v208_v5 }
  0x98   : > { %v214_v9 = vadd.f32 %v213_v8, %v207_v7 }
  0x9a   : > { %215 = vst [vmem:[%s199_s26] sm:$0xff] %v214_v9 }
  0x9b PF: > { %s13_s12 = sadd.s32 1, %s322_s12  }
  0x9c   : > { %p10_p4 = scmp.ge.s32.totalorder %s13_s12, 4  }
  0x9e   :  { %12 = sbr.rel (!%p10_p4) target bundleno = 1 (0x1), region = 68 }

</bundles_post_ra>
